<compile_context>
chip_gen: v7x
topology: tpu7x:2x2x1
jax: 0.10.0
libtpu: 0.0.40
codegen_flags: <defaults>
</compile_context>

<pallas_src>
import sys
import functools

import jax
import jax.numpy as jnp
from jax.experimental import pallas as pl
from jax.experimental.pallas import tpu as pltpu


# ---------------------------------------------------------------------------
# Hardware-aware sizing helpers (v5e: 128 MiB VMEM / 16 MiB scoped default,
# v6e: 128 / 32, v7x: 64 / 32 — so query and size explicitly)
# ---------------------------------------------------------------------------
def _vmem_capacity_bytes():
    try:
        cap = int(pltpu.get_tpu_info().vmem_capacity_bytes)
        if cap > 0:
            return cap
    except Exception:
        pass
    return 64 * 1024 * 1024          # conservative fallback (v7x per-TC VMEM)


def _scoped_vmem_limit(cap):
    # Raise the scoped limit well above the 16/32 MiB defaults, leave headroom.
    return int(max(32 << 20, min(cap - (8 << 20), int(0.8 * cap))))


def _pick_spatial_tile(C, HW, cap):
    """Lane tile for the channel-attention reduction (multiple of 128)."""
    budget = max(4 << 20, int(0.3 * cap))
    if HW <= 512 or 2 * C * HW * 4 <= budget:      # whole row fits: single tile
        return HW
    ts = (budget // (2 * 4 * C)) // 128 * 128      # double-buffered f32 block
    ts = max(256, min(ts, 8192))
    return min(ts, (HW // 128) * 128)


def _pick_channel_block(C, H, M, W, cap):
    """Channel block for the rank-k reconstruction kernel (bf16 operands)."""
    if C <= 8:
        return C
    budget = int(0.5 * cap)
    for cb in (32, 16, 8):
        if cb > C:
            continue
        need = (2 * (cb * H * M * 2 + cb * M * W * 2 + cb * M * 4)  # dbl-buf inputs
                + cb * H * W * 4 + cb * H * M * 6                   # recon / us temps
                + 8 * H * W * 4 + (2 << 20))                        # outs/scratch/slack
        if need <= budget:
            return cb
    return 8


# ---------------------------------------------------------------------------
# Kernel A: channel attention + gate normalization (spatially tiled reduction)
# ---------------------------------------------------------------------------
def _channel_attn_kernel(x_ref, w1_ref, w2_ref, yc_ref, sum_acc, max_acc,
                         *, HW, TS, LANES, NEED_MASK):
    s = pl.program_id(0)
    ns = pl.num_programs(0)

    @pl.when(s == 0)
    def _init():
        sum_acc[...] = jnp.zeros_like(sum_acc)
        max_acc[...] = jnp.full_like(max_acc, -jnp.inf)

    x = x_ref[...]                                               # (C, TS)

    def _accumulate(masked):
        if LANES == 1:
            if masked:
                col = jax.lax.broadcasted_iota(jnp.int32, x.shape, 1) + s * TS
                valid = col < HW
                xs = jnp.where(valid, x, 0.0)
                xm = jnp.where(valid, x, -jnp.inf)
            else:
                xs, xm = x, x
            sum_acc[...] = sum_acc[...] + jnp.sum(xs, axis=1, keepdims=True)
            max_acc[...] = jnp.maximum(max_acc[...],
                                       jnp.max(xm, axis=1, keepdims=True))
        else:
            # Lane-shaped (C, 128) accumulators: pure VPU adds/maxes per step,
            # single XLU cross-lane collapse in the finalize.
            acc_s = sum_acc[...]
            acc_m = max_acc[...]
            for j in range(TS // LANES):
                chunk = x[:, j * LANES:(j + 1) * LANES]          # lane-aligned
                if masked:
                    col = (jax.lax.broadcasted_iota(jnp.int32, chunk.shape, 1)
                           + s * TS + j * LANES)
                    valid = col < HW
                    cs = jnp.where(valid, chunk, 0.0)
                    cm = jnp.where(valid, chunk, -jnp.inf)
                else:
                    cs, cm = chunk, chunk
                acc_s = acc_s + cs
                acc_m = jnp.maximum(acc_m, cm)
            sum_acc[...] = acc_s
            max_acc[...] = acc_m

    if NEED_MASK:
        # Only the last spatial tile pays the iota/select masking cost.
        @pl.when(s < ns - 1)
        def _fast():
            _accumulate(False)

        @pl.when(s == ns - 1)
        def _tail():
            _accumulate(True)
    else:
        _accumulate(False)

    @pl.when(s == ns - 1)
    def _finalize():
        total = jnp.sum(sum_acc[...], axis=1, keepdims=True)     # (C, 1)
        mx = jnp.max(max_acc[...], axis=1, keepdims=True)        # (C, 1)
        avg = total * (1.0 / HW)
        # Batched MLP feed: columns [avg | max] stay independent through ReLU.
        sel = jax.lax.broadcasted_iota(jnp.int32, (avg.shape[0], 2), 1)
        v = jnp.where(sel == 0, avg, mx)                         # (C, 2)
        h = jnp.maximum(
            jnp.dot(w1_ref[...], v, preferred_element_type=jnp.float32), 0.0)
        o = jnp.dot(w2_ref[...], h, preferred_element_type=jnp.float32)
        y = jax.nn.sigmoid(o[:, 0:1] + o[:, 1:2])                # fc(avg)+fc(max)
        ymin = jnp.min(y)
        ymax = jnp.max(y)
        yc_ref[...] = (y - ymin) / (ymax - ymin + 1e-20)


def channel_attention(x2d, w1, w2, cap):
    C, HW = x2d.shape
    Hid = w1.shape[0]
    TS = _pick_spatial_tile(C, HW, cap)
    nS = -(-HW // TS)
    LANES = 128 if (TS % 128 == 0) else 1
    NEED_MASK = (HW % TS) != 0
    kernel = functools.partial(_channel_attn_kernel, HW=HW, TS=TS,
                               LANES=LANES, NEED_MASK=NEED_MASK)
    return pl.pallas_call(
        kernel,
        grid=(nS,),
        in_specs=[
            pl.BlockSpec((C, TS), lambda s: (0, s)),
            pl.BlockSpec((Hid, C), lambda s: (0, 0)),
            pl.BlockSpec((C, Hid), lambda s: (0, 0)),
        ],
        out_specs=pl.BlockSpec((C, 1), lambda s: (0, 0)),
        out_shape=jax.ShapeDtypeStruct((C, 1), jnp.float32),
        scratch_shapes=[pltpu.VMEM((C, LANES), jnp.float32),
                        pltpu.VMEM((C, LANES), jnp.float32)],
        compiler_params=pltpu.CompilerParams(
            dimension_semantics=("arbitrary",),
            vmem_limit_bytes=_scoped_vmem_limit(cap)),
    )(x2d, w1, w2)


# ---------------------------------------------------------------------------
# Kernel B: channel-blocked rank-k reconstruction (bf16 MXU) + mean/max pooling,
#           channel blocks split across TensorCores via a "parallel" grid axis
# ---------------------------------------------------------------------------
def _lowrank_block_kernel(u_ref, s_ref, vt_ref, k_ref, sum_out, max_out,
                          sum_acc, max_acc, *, C, CB, NBLK_PER_CORE):
    core = pl.program_id(0)
    j = pl.program_id(1)
    nj = pl.num_programs(1)

    @pl.when(j == 0)
    def _init():
        sum_acc[...] = jnp.zeros_like(sum_acc)
        max_acc[...] = jnp.full_like(max_acc, -jnp.inf)

    # --- rank-k reconstruction for a block of CB channels (batched bf16 matmul) ---
    s = s_ref[...]                                               # (CB, M) f32, desc
    k = k_ref[...]                                               # (CB, 1) int32
    m_idx = jax.lax.broadcasted_iota(jnp.int32, s.shape, 1)
    s_m = jnp.where(m_idx < k, s, 0.0)                           # keep top-k sing. vals
    # f32 singular-value scaling, bf16 matmul operands, f32 accumulation.
    us = (u_ref[...].astype(jnp.float32) * s_m[:, None, :]).astype(jnp.bfloat16)
    recon = jnp.einsum('chm,cmw->chw', us, vt_ref[...],
                       preferred_element_type=jnp.float32)       # (CB, H, W) f32

    # Mask channels past C (ragged last block, or the clamped block a core
    # re-visits when its block share overruns).  Zero is neutral for the sum
    # and for the max: the min-gate channel always has yc == 0 -> k == 0 -> an
    # all-zero reconstruction already present in the reference channel stack.
    base = (core * NBLK_PER_CORE + j) * CB
    c_idx = jax.lax.broadcasted_iota(jnp.int32, recon.shape, 0) + base
    recon = jnp.where(c_idx < C, recon, 0.0)

    sum_acc[...] = sum_acc[...] + jnp.sum(recon, axis=0)
    max_acc[...] = jnp.maximum(max_acc[...], jnp.max(recon, axis=0))

    @pl.when(j == nj - 1)
    def _store():
        sum_out[0, :, :] = sum_acc[...]
        max_out[0, :, :] = max_acc[...]


def lowrank_pool_partials(U_bf16, S, Vh_bf16, k2d, *, C, H, M, W, cap):
    CB = _pick_channel_block(C, H, M, W, cap)
    n_blk = -(-C // CB)
    # Split channel blocks across 2 TensorCores (v7x); on 1-TC chips this is a
    # harmless sequential outer loop.
    ncores = 2 if n_blk >= 2 else 1
    nb_per_core = -(-n_blk // ncores)

    def blk(core, j):
        # Clamp to a valid block (no OOB DMA); the duplicated block is fully
        # masked in-kernel via the channel-validity predicate.
        return jnp.minimum(core * nb_per_core + j, n_blk - 1)

    kernel = functools.partial(_lowrank_block_kernel, C=C, CB=CB,
                               NBLK_PER_CORE=nb_per_core)
    return pl.pallas_call(
        kernel,
        grid=(ncores, nb_per_core),
        in_specs=[
            pl.BlockSpec((CB, H, M), lambda c, j: (blk(c, j), 0, 0)),  # U  (bf16)
            pl.BlockSpec((CB, M),    lambda c, j: (blk(c, j), 0)),     # S  (f32)
            pl.BlockSpec((CB, M, W), lambda c, j: (blk(c, j), 0, 0)),  # Vh (bf16)
            pl.BlockSpec((CB, 1),    lambda c, j: (blk(c, j), 0)),     # k  (int32)
        ],
        out_specs=(
            pl.BlockSpec((1, H, W), lambda c, j: (c, 0, 0)),
            pl.BlockSpec((1, H, W), lambda c, j: (c, 0, 0)),
        ),
        out_shape=(jax.ShapeDtypeStruct((ncores, H, W), jnp.float32),
                   jax.ShapeDtypeStruct((ncores, H, W), jnp.float32)),
        scratch_shapes=[pltpu.VMEM((H, W), jnp.float32),
                        pltpu.VMEM((H, W), jnp.float32)],
        compiler_params=pltpu.CompilerParams(
            dimension_semantics=("parallel", "arbitrary"),
            vmem_limit_bytes=_scoped_vmem_limit(cap)),
    )(U_bf16, S, Vh_bf16, k2d)


# ---------------------------------------------------------------------------
# Kernel C: merge per-core partials + 7x7 conv (2->1, pad 3) + EPS clamp + sigmoid
# ---------------------------------------------------------------------------
def _merge_conv_kernel(sum_ref, max_ref, w_ref, o_ref, pad_buf, *, C, H, W, eps):
    avg = jnp.sum(sum_ref[...], axis=0) * (1.0 / C)              # mean over channels
    mx = jnp.max(max_ref[...], axis=0)                           # max over channels

    pad_buf[...] = jnp.zeros_like(pad_buf)                       # zero halo (pad=3)
    pad_buf[0, 3:3 + H, 3:3 + W] = avg
    pad_buf[1, 3:3 + H, 3:3 + W] = mx

    acc = jnp.zeros((H, W), jnp.float32)
    for c in range(2):
        padc = pad_buf[c]                                        # (H+6, W+6)
        # Hoist the 7 lane (kw) shifts once per channel; the inner kh loop only
        # uses cheap sublane slices (14 lane slices instead of 98).
        shifted = [padc[:, kw:kw + W] for kw in range(7)]
        for kh in range(7):
            for kw in range(7):
                wv = w_ref[c * 49 + kh * 7 + kw]                 # scalar from SMEM
                acc = acc + wv * shifted[kw][kh:kh + H, :]
    acc = jnp.where(acc < eps, jnp.float32(eps), acc)            # x[x < EPS] = EPS
    o_ref[...] = jax.nn.sigmoid(acc)


def merge_conv(sum_parts, max_parts, w_flat, *, C, H, W, eps, cap):
    P = sum_parts.shape[0]
    kernel = functools.partial(_merge_conv_kernel, C=C, H=H, W=W, eps=eps)
    return pl.pallas_call(
        kernel,
        grid=(1,),
        in_specs=[
            pl.BlockSpec((P, H, W), lambda i: (0, 0, 0)),
            pl.BlockSpec((P, H, W), lambda i: (0, 0, 0)),
            pl.BlockSpec(memory_space=pltpu.MemorySpace.SMEM),   # conv weights
        ],
        out_specs=pl.BlockSpec((H, W), lambda i: (0, 0)),
        out_shape=jax.ShapeDtypeStruct((H, W), jnp.float32),
        scratch_shapes=[pltpu.VMEM((2, H + 6, W + 6), jnp.float32)],
        compiler_params=pltpu.CompilerParams(
            dimension_semantics=("arbitrary",),
            vmem_limit_bytes=_scoped_vmem_limit(cap)),
    )(sum_parts, max_parts, w_flat)


# ---------------------------------------------------------------------------
# Full AFAR forward
# ---------------------------------------------------------------------------
def afar_forward(x, params, kv=1.0, eps=float(sys.float_info.epsilon)):
    b, C, H, W = x.shape
    assert b == 1, "AFAR.forward squeezes batch dim 0; only batch == 1 supported"
    x0 = x[0].astype(jnp.float32)                                # (C, H, W)
    HW = H * W
    M = min(H, W)
    cap = _vmem_capacity_bytes()

    # --- channel attention gates (Pallas kernel A) ---
    yc = channel_attention(x0.reshape(C, HW),
                           params["w1"].astype(jnp.float32),
                           params["w2"].astype(jnp.float32), cap)[:, 0]  # (C,)
    k_arr = jnp.floor(M * kv * yc).astype(jnp.int32)             # k = int(len(s)*kv*yc)

    # --- per-channel SVD (plain JAX) ---
    # TODO(synk): torch.svd has no Pallas equivalent; jnp.linalg.svd used here.
    # TODO(synk): k-driven truncation of the M contraction (scalar prefetch +
    #             bounded slices) is left out; full-M blocks are reconstructed.
    U, S, Vh = jnp.linalg.svd(x0, full_matrices=False)           # (C,H,M),(C,M),(C,M,W)

    # bf16 operands: halves U/Vh HBM traffic of the HBM-bound recon kernel and
    # runs the MXU at native bf16 rate; scaling and accumulation stay f32.
    U_bf = U.astype(jnp.bfloat16)
    Vh_bf = Vh.astype(jnp.bfloat16)

    # --- rank-k recon + channel mean/max partials (Pallas kernel B) ---
    sum_parts, max_parts = lowrank_pool_partials(
        U_bf, S, Vh_bf, k_arr.reshape(C, 1), C=C, H=H, M=M, W=W, cap=cap)

    # --- merge + 7x7 conv + clamp + sigmoid (Pallas kernel C) ---
    w_flat = params["wconv"].reshape(-1).astype(jnp.float32)     # (2*7*7,)
    out = merge_conv(sum_parts, max_parts, w_flat, C=C, H=H, W=W, eps=eps, cap=cap)
    return out.reshape(1, 1, H, W)


if __name__ == "__main__":
    key = jax.random.PRNGKey(0)
    C, H, W = 8, 16, 16            # small shapes; batch must be 1
    reduction = 4
    Hid = C // reduction

    k1, k2, k3, k4 = jax.random.split(key, 4)
    x = jax.random.normal(k1, (1, C, H, W), jnp.float32)
    params = {
        "w1": jax.random.normal(k2, (Hid, C), jnp.float32) * 0.3,   # Linear(C, C//r)
        "w2": jax.random.normal(k3, (C, Hid), jnp.float32) * 0.3,   # Linear(C//r, C)
        "wconv": jax.random.normal(k4, (1, 2, 7, 7), jnp.float32) * 0.1,
    }

    out = afar_forward(x, params, kv=1.0)
    out = jax.block_until_ready(out)
    assert out.shape == (1, 1, H, W)
    assert bool(jnp.all(jnp.isfinite(out)))
    print("KERNEL_OK")
</pallas_src>

<mosaic_0001>
module attributes {stable_mosaic.version = 11 : i64} {
  func.func @_channel_attn_kernel(%arg0: i32, %arg1: memref<8x256xf32, #tpu.memory_space<vmem>>, %arg2: memref<2x8xf32, #tpu.memory_space<vmem>>, %arg3: memref<8x2xf32, #tpu.memory_space<vmem>>, %arg4: memref<8x1xf32, #tpu.memory_space<vmem>>, %arg5: memref<8x128xf32, #tpu.memory_space<vmem>>, %arg6: memref<8x128xf32, #tpu.memory_space<vmem>>) attributes {dimension_semantics = [#tpu.dimension_semantics<arbitrary>], iteration_bounds = array<i64: 1>, scalar_prefetch = 0 : i64, scratch_operands = 2 : i64, tpu.core_type = #tpu.core_type<tc>, window_params = [{transform_indices = @transform_0, window_bounds = array<i64: 8, 256>}, {pipeline_mode = #tpu.pipeline_mode<synchronous>, transform_indices = @transform_1, window_bounds = array<i64: 2, 8>}, {pipeline_mode = #tpu.pipeline_mode<synchronous>, transform_indices = @transform_2, window_bounds = array<i64: 8, 2>}, {pipeline_mode = #tpu.pipeline_mode<synchronous>, transform_indices = @transform_3, window_bounds = array<i64: 8, 1>}]} {
    %c0_i32 = arith.constant 0 : i32
    %0 = arith.cmpi eq, %arg0, %c0_i32 : i32
    %1 = arith.extui %0 : i1 to i32
    %c0_i32_0 = arith.constant 0 : i32
    %2 = arith.cmpi ne, %1, %c0_i32_0 : i32
    scf.if %2 {
      %cst = arith.constant 0.000000e+00 : f32
      %17 = vector.broadcast %cst : f32 to vector<8x128xf32>
      %c0_12 = arith.constant 0 : index
      %c0_13 = arith.constant 0 : index
      %18 = vector.load %arg5[%c0_12, %c0_13] : memref<8x128xf32, #tpu.memory_space<vmem>>, vector<8x128xf32>
      tpu.vector_store %arg5[%c0_12, %c0_13], %17 {strides = array<i32>} : memref<8x128xf32, #tpu.memory_space<vmem>>, vector<8x128xf32>,
      %cst_14 = arith.constant 0xFF800000 : f32
      %19 = vector.broadcast %cst_14 : f32 to vector<8x128xf32>
      %c0_15 = arith.constant 0 : index
      %c0_16 = arith.constant 0 : index
      %20 = vector.load %arg6[%c0_15, %c0_16] : memref<8x128xf32, #tpu.memory_space<vmem>>, vector<8x128xf32>
      tpu.vector_store %arg6[%c0_15, %c0_16], %19 {strides = array<i32>} : memref<8x128xf32, #tpu.memory_space<vmem>>, vector<8x128xf32>,
    } else {
    }
    %c0 = arith.constant 0 : index
    %c0_1 = arith.constant 0 : index
    %3 = vector.load %arg1[%c0, %c0_1] : memref<8x256xf32, #tpu.memory_space<vmem>>, vector<8x256xf32>
    %c0_2 = arith.constant 0 : index
    %c0_3 = arith.constant 0 : index
    %4 = vector.load %arg5[%c0_2, %c0_3] : memref<8x128xf32, #tpu.memory_space<vmem>>, vector<8x128xf32>
    %c0_4 = arith.constant 0 : index
    %c0_5 = arith.constant 0 : index
    %5 = vector.load %arg6[%c0_4, %c0_5] : memref<8x128xf32, #tpu.memory_space<vmem>>, vector<8x128xf32>
    %6 = vector.extract_strided_slice %3 {offsets = [0, 0], sizes = [8, 128], strides = [1, 1]} : vector<8x256xf32> to vector<8x128xf32>
    %7 = arith.addf %4, %6 : vector<8x128xf32>
    %8 = arith.maximumf %5, %6 : vector<8x128xf32>
    %9 = vector.extract_strided_slice %3 {offsets = [0, 128], sizes = [8, 128], strides = [1, 1]} : vector<8x256xf32> to vector<8x128xf32>
    %10 = arith.addf %7, %9 : vector<8x128xf32>
    %11 = arith.maximumf %8, %9 : vector<8x128xf32>
    %c0_6 = arith.constant 0 : index
    %c0_7 = arith.constant 0 : index
    %12 = vector.load %arg5[%c0_6, %c0_7] : memref<8x128xf32, #tpu.memory_space<vmem>>, vector<8x128xf32>
    tpu.vector_store %arg5[%c0_6, %c0_7], %10 {strides = array<i32>} : memref<8x128xf32, #tpu.memory_space<vmem>>, vector<8x128xf32>,
    %c0_8 = arith.constant 0 : index
    %c0_9 = arith.constant 0 : index
    %13 = vector.load %arg6[%c0_8, %c0_9] : memref<8x128xf32, #tpu.memory_space<vmem>>, vector<8x128xf32>
    tpu.vector_store %arg6[%c0_8, %c0_9], %11 {strides = array<i32>} : memref<8x128xf32, #tpu.memory_space<vmem>>, vector<8x128xf32>,
    %c0_i32_10 = arith.constant 0 : i32
    %14 = arith.cmpi eq, %arg0, %c0_i32_10 : i32
    %15 = arith.extui %14 : i1 to i32
    %c0_i32_11 = arith.constant 0 : i32
    %16 = arith.cmpi ne, %15, %c0_i32_11 : i32
    scf.if %16 {
      %c0_12 = arith.constant 0 : index
      %c0_13 = arith.constant 0 : index
      %17 = vector.load %arg5[%c0_12, %c0_13] : memref<8x128xf32, #tpu.memory_space<vmem>>, vector<8x128xf32>
      %cst = arith.constant dense<0.000000e+00> : vector<8xf32>
      %18 = vector.multi_reduction <add>, %17, %cst [1] : vector<8x128xf32> to vector<8xf32>
      %19 = vector.shape_cast %18 : vector<8xf32> to vector<8x1xf32>
      %c0_14 = arith.constant 0 : index
      %c0_15 = arith.constant 0 : index
      %20 = vector.load %arg6[%c0_14, %c0_15] : memref<8x128xf32, #tpu.memory_space<vmem>>, vector<8x128xf32>
      %cst_16 = arith.constant dense<0xFF800000> : vector<8xf32>
      %21 = vector.multi_reduction <maximumf>, %20, %cst_16 [1] : vector<8x128xf32> to vector<8xf32>
      %22 = vector.shape_cast %21 : vector<8xf32> to vector<8x1xf32>
      %cst_17 = arith.constant 3.906250e-03 : f32
      %23 = vector.broadcast %cst_17 : f32 to vector<8x1xf32>
      %24 = arith.mulf %19, %23 : vector<8x1xf32>
      %25 = tpu.iota {dimensions = array<i32: 1>} : vector<8x2xi32>
      %c0_i32_18 = arith.constant 0 : i32
      %26 = vector.broadcast %c0_i32_18 : i32 to vector<8x2xi32>
      %27 = arith.cmpi eq, %25, %26 : vector<8x2xi32>
      %28 = vector.shape_cast %24 : vector<8x1xf32> to vector<8x1xf32>
      %29 = vector.broadcast %28 : vector<8x1xf32> to vector<8x2xf32>
      %30 = vector.shape_cast %22 : vector<8x1xf32> to vector<8x1xf32>
      %31 = vector.broadcast %30 : vector<8x1xf32> to vector<8x2xf32>
      %32 = arith.select %27, %29, %31 : vector<8x2xi1>, vector<8x2xf32>
      %c0_19 = arith.constant 0 : index
      %c0_20 = arith.constant 0 : index
      %33 = vector.load %arg2[%c0_19, %c0_20] : memref<2x8xf32, #tpu.memory_space<vmem>>, vector<2x8xf32>
      %cst_21 = arith.constant dense<0.000000e+00> : vector<2x2xf32>
      %34 = tpu.matmul %33, %32, %cst_21 {dimension_numbers = #tpu.dot_dimension_numbers<[1], [0], [0], [1], [0, 0, 1, 1], [], []>} : vector<2x8xf32>, vector<8x2xf32>, vector<2x2xf32> -> vector<2x2xf32>
      %cst_22 = arith.constant 0.000000e+00 : f32
      %35 = vector.broadcast %cst_22 : f32 to vector<2x2xf32>
      %36 = arith.maximumf %34, %35 : vector<2x2xf32>
      %c0_23 = arith.constant 0 : index
      %c0_24 = arith.constant 0 : index
      %37 = vector.load %arg3[%c0_23, %c0_24] : memref<8x2xf32, #tpu.memory_space<vmem>>, vector<8x2xf32>
      %cst_25 = arith.constant dense<0.000000e+00> : vector<8x2xf32>
      %38 = tpu.matmul %37, %36, %cst_25 {dimension_numbers = #tpu.dot_dimension_numbers<[1], [0], [0], [1], [0, 0, 1, 1], [], []>} : vector<8x2xf32>, vector<2x2xf32>, vector<8x2xf32> -> vector<8x2xf32>
      %39 = vector.extract_strided_slice %38 {offsets = [0, 0], sizes = [8, 1], strides = [1, 1]} : vector<8x2xf32> to vector<8x1xf32>
      %40 = vector.extract_strided_slice %38 {offsets = [0, 1], sizes = [8, 1], strides = [1, 1]} : vector<8x2xf32> to vector<8x1xf32>
      %41 = arith.addf %39, %40 : vector<8x1xf32>
      %42 = arith.negf %41 : vector<8x1xf32>
      %43 = math.exp %42 : vector<8x1xf32>
      %cst_26 = arith.constant 1.000000e+00 : f32
      %44 = vector.broadcast %cst_26 : f32 to vector<8x1xf32>
      %45 = arith.addf %44, %43 : vector<8x1xf32>
      %46 = arith.divf %44, %45 : vector<8x1xf32>
      %47 = vector.shape_cast %46 : vector<8x1xf32> to vector<1x8x1xf32>
      %cst_27 = arith.constant dense<0x7F800000> : vector<1xf32>
      %48 = vector.multi_reduction <minimumf>, %47, %cst_27 [1, 2] : vector<1x8x1xf32> to vector<1xf32>
      %49 = vector.shape_cast %48 : vector<1xf32> to vector<1x1x1xf32>
      %50 = vector.extract %49[0, 0, 0] : f32 from vector<1x1x1xf32>
      %51 = vector.shape_cast %46 : vector<8x1xf32> to vector<1x8x1xf32>
      %cst_28 = arith.constant dense<0xFF800000> : vector<1xf32>
      %52 = vector.multi_reduction <maximumf>, %51, %cst_28 [1, 2] : vector<1x8x1xf32> to vector<1xf32>
      %53 = vector.shape_cast %52 : vector<1xf32> to vector<1x1x1xf32>
      %54 = vector.extract %53[0, 0, 0] : f32 from vector<1x1x1xf32>
      %55 = vector.broadcast %50 : f32 to vector<8x1xf32>
      %56 = arith.subf %46, %55 : vector<8x1xf32>
      %57 = arith.subf %54, %50 : f32
      %cst_29 = arith.constant 9.99999968E-21 : f32
      %58 = arith.addf %57, %cst_29 : f32
      %59 = vector.broadcast %58 : f32 to vector<8x1xf32>
      %60 = arith.divf %56, %59 : vector<8x1xf32>
      %c0_30 = arith.constant 0 : index
      %c0_31 = arith.constant 0 : index
      %61 = vector.load %arg4[%c0_30, %c0_31] : memref<8x1xf32, #tpu.memory_space<vmem>>, vector<8x1xf32>
      tpu.vector_store %arg4[%c0_30, %c0_31], %60 {strides = array<i32>} : memref<8x1xf32, #tpu.memory_space<vmem>>, vector<8x1xf32>,
    } else {
    }
    return
  }
  func.func @transform_0(%arg0: i32) -> (i32, i32) {
    %c0_i32 = arith.constant 0 : i32
    %c0_i32_0 = arith.constant 0 : i32
    return %c0_i32, %arg0 : i32, i32
  }
  func.func @transform_1(%arg0: i32) -> (i32, i32) {
    %c0_i32 = arith.constant 0 : i32
    %c0_i32_0 = arith.constant 0 : i32
    %c0_i32_1 = arith.constant 0 : i32
    return %c0_i32, %c0_i32_0 : i32, i32
  }
  func.func @transform_2(%arg0: i32) -> (i32, i32) {
    %c0_i32 = arith.constant 0 : i32
    %c0_i32_0 = arith.constant 0 : i32
    %c0_i32_1 = arith.constant 0 : i32
    return %c0_i32, %c0_i32_0 : i32, i32
  }
  func.func @transform_3(%arg0: i32) -> (i32, i32) {
    %c0_i32 = arith.constant 0 : i32
    %c0_i32_0 = arith.constant 0 : i32
    %c0_i32_1 = arith.constant 0 : i32
    return %c0_i32, %c0_i32_0 : i32, i32
  }
}

</mosaic_0001>

<bundles_post_ra>
// kernel: tpu_custom_call.1
= control target key start
LH: loop header
LB: loop body
LE: loop exit
PB: predicated region body
PF: predicated region fallthrough
CT: control target
= control target key end

     0   :  { %8 = vsyncpa [#allocation5], 0  ;;  %s312_s12 = smov [#allocation4]   ;;  %s360_s0 = inlined_call_operand.hbm [shape: f32[8,256], index: 0, kind: input, shape index: {}]   ;;  %s361_s1 = inlined_call_operand.vmem [shape: f32[2,8], index: 1, kind: input, shape index: {}]   ;;  %s362_s2 = inlined_call_operand.vmem [shape: f32[8,2], index: 2, kind: input, shape index: {}]   ;;  %s363_s3 = inlined_call_operand.vmem [shape: f32[8,1], index: 3, kind: output, shape index: {}]  }
   0x1   :  { %s15_s13 = sshll.u32 %s312_s12, 4  ;;  %s288_s16 = scalar_lea.hbm %s360_s0, 256  ;;  %s16_s13 = int_to_ptr.vmem [resolvable:$true] %s15_s13 }
   0x2   :  { %p289_p0 = scmp.ne.s32.totalorder %s360_s0, %s288_s16  ;;  %p292_p1 = scmp.lt.u32.totalorder %s288_s16, %s360_s0 }
   0x4   :  { %p294_p2 = pnand %p292_p1, %p289_p0 }
   0x6   :  { %297 = shalt.err (!%p294_p2)
}
   0x7   :  { %s298_s21 = scalar_lea.vmem %s16_s13, 256  ;;  %p303_p4 = scmp.lt.s32.totalorder %s16_s13, %s16_s13 }
   0x8   :  { %p299_p3 = scmp.ne.s32.totalorder %s16_s13, %s298_s21  ;;  %p304_p5 = scmp.lt.s32.totalorder %s298_s21, %s298_s21 }
   0xa   :  { %p305_p6 = por %p304_p5, %p303_p4 }
   0xc   :  { %p306_p7 = pnand %p305_p6, %p299_p3 }
   0xe   :  { %309 = shalt.err (!%p306_p7)
}
   0xf   :  { %18 = dma.hbm_to_vmem [thread:$0]  %s360_s0, 256, %s16_s13, [#allocation5]  }
  0x10   :  { %310 = dma.done.wait [#allocation5], 256  }
  0x11   :  { %311 = vsyncadd [#allocation5], 4294967040  ;;  %v32_v0 = vld [vmem:[#allocation4] sm:$0xff]  ;;  %v33_v1 = vld [vmem:[#allocation4 + $0x8] sm:$0xff]  ;;  %v313_v4 = vmov 0.0   ;;  %vm314_vm0 = vmmov 0   ;;  %v52_v5 = vlaneseq }
  0x12   :  { %v38_v2 = vadd.f32 %v33_v1, %v32_v0  ;;  %v39_v3 = vmax.f32 %v32_v0, %v33_v1  ;;  %264 = vmatprep.subr.mxu0 %v313_v4  ;;  %269 = vmatprep.subr.mxu1 %v313_v4  ;;  %v56_v10 = vld [vmem:[%s361_s1] sm:$0x3]  ;;  %vm57_vm2 = vcmask 64512   ;;  %vm137_vm3 = vcmask 1041408   ;;  %s315_s27 = smov 127  }
  0x13   :  { %266 = vmatprep.mubr.msk.f32.mxu0 %vm314_vm0, %v313_v4  ;;  %271 = vmatprep.mubr.msk.f32.mxu1 %vm314_vm0, %v313_v4  ;;  %v53_v6 = vand.u32 127, %v52_v5  ;;  %v132_v15 = vld [vmem:[%s362_s2] sm:$0xff]  ;;  %vm133_vm4 = vcmask 15360   ;;  %vm222_vm5 = vcmask 7168  }
  0x14   :  { %46 = vadd.xlane.f32.xlu0 %v38_v2 }
  0x15   :  { %vm54_vm1 = vcmp.eq.s32.totalorder %v53_v6, 0 }
  0x18   :  { %49 = vmax.xlane.f32.xlu0 %v39_v3 }
  0xa1   :  { %v47_v7 = vpop.xlane.xlu0 %46 }
  0xa2   :  { %v51_v8 = vmul.f32 0.00390625, %v47_v7 }
  0xa5   :  { %v50_v9 = vpop.xlane.xlu0 %49 }
  0xa6   :  { %v55_v11 = vsel %vm54_vm1, %v51_v8, %v50_v9 }
  0xa7   :  { %265 = vmatpush3.msra.mxu0 %v55_v11 }
  0xa8   :  { %267 = vmatmul.mubr.msk.f32.vlgmr.msra.gmra.mrb[0].mxu0 %vm57_vm2, %v56_v10 }
 0x17b   :  { %v127_v12 = vpop.f32.mrb[0].mxu0 }
 0x17c   :  { %v131_v13 = vmax.f32 %v127_v12, 0.0  ;;  %v268_v14 = vpop.f32.mrb[1].mxu0 }
 0x17e   :  { %270 = vmatpush3.msk.msra.mxu1 %vm137_vm3, %v131_v13 }
 0x17f   :  { %272 = vmatmul.mubr.msk.f32.vlgmr.msra.gmra.mrb[0].mxu1 %vm133_vm4, %v132_v15 }
 0x252   :  { %v207_v16 = vpop.f32.mrb[0].mxu1 }
 0x253   :  { %212 = vrot.lane.b32.xlu1 %v207_v16, %s315_s27  ;;  %v273_v17 = vpop.f32.mrb[1].mxu1 }
 0x2c5   :  { %v213_v18 = vpop.permute.xlu1 %212 }
 0x2c6   :  { %v215_v19 = vadd.f32 %v213_v18, %v207_v16 }
 0x2c8   :  { %v259_v20 = vmul.f32 -1.442695, %v215_v19 }
 0x2ca   :  { %282 = vpow2.f32 %v259_v20 }
 0x2d4   :  { %v283_v21 = vpop.eup %282 }
 0x2d5   :  { %v219_v22 = vadd.f32 1.0, %v283_v21 }
 0x2d7   :  { %284 = vrcp.f32 %v219_v22 }
 0x2e1   :  { %v285_v23 = vpop.eup %284 }
 0x2e2   :  { %v233_v24 = vsel %vm222_vm5, %v285_v23, -inf  ;;  %v223_v25 = vsel %vm222_vm5, %v285_v23, inf }
 0x2e3   :  { %234 = vmax.xlane.f32.xlu0 %v233_v24  ;;  %224 = vmin.xlane.f32.xlu1 %v223_v25 }
 0x370   :  { %v235_v26 = vpop.xlane.xlu0 %234  ;;  %v225_v27 = vpop.xlane.xlu1 %224 }
 0x371   :  { %v236_v28 = vrot.slane %v235_v26, 4  ;;  %v226_v29 = vrot.slane %v225_v27, 4 }
 0x373   :  { %v237_v30 = vmax.f32 %v235_v26, %v236_v28  ;;  %v227_v31 = vmin.f32 %v225_v27, %v226_v29 }
 0x375   :  { %v238_v32 = vrot.slane %v237_v30, 2  ;;  %v228_v33 = vrot.slane %v227_v31, 2 }
 0x377   :  { %v239_v34 = vmax.f32 %v237_v30, %v238_v32  ;;  %v229_v35 = vmin.f32 %v227_v31, %v228_v33 }
 0x379   :  { %v230_v36 = vrot.slane %v229_v35, 1  ;;  %v240_v37 = vrot.slane %v239_v34, 1 }
 0x37b   :  { %v231_v38 = vmin.f32 %v229_v35, %v230_v36  ;;  %v241_v39 = vmax.f32 %v239_v34, %v240_v37 }
 0x37d   :  { %274 = vpush %v231_v38 }
 0x37e   :  { %276 = vpush %v241_v39 }
 0x3ae   :  { %s275_s1 = spop %274 }
 0x3af   :  { %s277_s2 = spop %276  ;;  %v243_v41 = vstv %s275_s1 }
 0x3b0   :  { %s245_s28 = ssub.f32 %s277_s2, %s275_s1  ;;  %v244_v42 = vsub.f32 %v285_v23, %v243_v41 }
 0x3b2   :  { %s246_s29 = sadd.f32 1e-20, %s245_s28 }
 0x3b4   :  { %v247_v40 = vstv %s246_s29 }
 0x3b5   :  { %286 = vrcp.f32 %v247_v40 }
 0x3bf   :  { %v287_v43 = vpop.eup %286 }
 0x3c0   :  { %v249_v44 = vmul.f32 %v287_v43, %v244_v42 }
 0x3c2   :  { %250 = vst.msk [vmem:[%s363_s3] sm:$0xff] %vm222_vm5, %v249_v44 }
 0x3c3   :  { %255 = vsyncpa [#allocation5], 1 }

</bundles_post_ra>
